<compile_context>
chip_gen: v7x
topology: tpu7x:2x2x1
jax: 0.10.0
libtpu: 0.0.40
codegen_flags: <defaults>
</compile_context>

<pallas_src>
import functools

import jax
import jax.numpy as jnp
import numpy as np
from jax.experimental import pallas as pl
from jax.experimental.pallas import tpu as pltpu

RRELU_SLOPE = (1.0 / 8.0 + 1.0 / 3.0) / 2.0  # eval-mode RReLU slope
BN_EPS = 1e-5


def _rrelu(x):
    return jnp.where(x >= 0, x, x * RRELU_SLOPE)


def _round_up(x, m):
    return -(-x // m) * m


# ----------------------------------------------------------------------------
# Pallas kernel: one (batch, spatial-tile) block of tm input locations, producing
# the 2x2 = 4 output sub-positions for each of them.  Channel-major layout:
# tiles are (C, tm) with the spatial axis on lanes.
# ----------------------------------------------------------------------------
def _upsampling_bottleneck_kernel(
    x_ref,        # (1, Cin, tm)                       bf16
    psel_ref,     # (1, Cout, tm)                      int32, argmax sub-position 0..3
    w01_ref,      # (Cout+Cinter, Cin)                 bf16  main conv1x1 | ext conv1
    wt_ref,       # (4*Cinter, Cinter)                 bf16  tconv, 4 sub-positions stacked
    w3_ref,       # (4*Cout, 4*Cinter)                 bf16  conv3, block-diagonal
    bias_ref,     # (Cout+Cinter + 4*Cinter + 4*Cout, 1) f32  BN-folded biases, packed
    out_ref,      # (1, 4*Cout, tm)                    f32
    *, c_inter, c_out,
):
    x = x_ref[0]                               # (Cin, tm)
    psel = psel_ref[0]                         # (Cout, tm)

    c01 = c_out + c_inter
    bias = bias_ref[...]                       # (.., 1) -> broadcast along lanes
    b01 = bias[0:c01, :]
    b2 = bias[c01:c01 + 4 * c_inter, :]
    b3 = bias[c01 + 4 * c_inter:, :]

    # stage 1: fused (main conv1x1 | ext conv1), BN folded into weights, bias add only
    y01 = jnp.dot(w01_ref[...], x, preferred_element_type=jnp.float32) + b01
    main = y01[0:c_out, :]                     # (Cout, tm)   main branch, pre-unpool
    y1 = _rrelu(y01[c_out:, :])                # (Cinter, tm)

    # stage 2: 2x2 / stride-2 transposed conv (4 sub-positions stacked) + BN + RReLU
    t = jnp.dot(wt_ref[...], y1.astype(jnp.bfloat16),
                preferred_element_type=jnp.float32) + b2
    t = _rrelu(t)                              # (4*Cinter, tm)

    # stage 3: 1x1 conv, block-diagonal over the 4 sub-positions + BN
    z = jnp.dot(w3_ref[...], t.astype(jnp.bfloat16),
                preferred_element_type=jnp.float32) + b3   # (4*Cout, tm)

    # MaxUnpool2d scatter == per-sub-position compare/select, residual add, RReLU.
    # (MaxPool2d(2) indices always lie inside their own 2x2 window -> gather == scatter.)
    for p in range(4):                         # p = a*2 + b inside the 2x2 output window
        up = jnp.where(psel == p, main, 0.0)
        out_ref[0, p * c_out:(p + 1) * c_out, :] = _rrelu(
            up + z[p * c_out:(p + 1) * c_out, :])


# ----------------------------------------------------------------------------
# Wrapper: layout prep + pallas_call
# ----------------------------------------------------------------------------
def upsampling_bottleneck(x_nchw, indices_nchw, kp, *, tm=512):
    N, Cin, H, W = x_nchw.shape
    Cout = indices_nchw.shape[1]
    Cinter = kp["wt"].shape[1]
    Wo = 2 * W
    HW = H * W

    assert tm % 128 == 0
    tm = min(tm, _round_up(HW, 128))
    HWp = _round_up(HW, tm)

    # keep the natural (N, C, H*W) memory order -> no input-side transpose
    x3 = x_nchw.reshape(N, Cin, HW).astype(jnp.bfloat16)
    idx = indices_nchw.reshape(N, Cout, HW).astype(jnp.int32)
    # reduce the flat MaxPool index to its sub-position code (a*2 + b) in the 2x2 window
    psel = 2 * ((idx // Wo) % 2) + (idx % 2)

    pad = HWp - HW
    if pad:
        x3 = jnp.pad(x3, ((0, 0), (0, 0), (0, pad)))
        psel = jnp.pad(psel, ((0, 0), (0, 0), (0, pad)))

    kern = functools.partial(_upsampling_bottleneck_kernel,
                             c_inter=Cinter, c_out=Cout)

    out3 = pl.pallas_call(
        kern,
        out_shape=jax.ShapeDtypeStruct((N, 4 * Cout, HWp), jnp.float32),
        grid=(N, HWp // tm),
        in_specs=[
            pl.BlockSpec((1, Cin, tm), lambda n, i: (n, 0, i)),
            pl.BlockSpec((1, Cout, tm), lambda n, i: (n, 0, i)),
            pl.BlockSpec(kp["w01"].shape, lambda n, i: (0, 0)),
            pl.BlockSpec(kp["wt"].shape, lambda n, i: (0, 0)),
            pl.BlockSpec(kp["w3"].shape, lambda n, i: (0, 0)),
            pl.BlockSpec(kp["bias"].shape, lambda n, i: (0, 0)),
        ],
        out_specs=pl.BlockSpec((1, 4 * Cout, tm), lambda n, i: (n, 0, i)),
        compiler_params=pltpu.CompilerParams(
            dimension_semantics=("parallel", "parallel")),
    )(x3, psel, kp["w01"], kp["wt"], kp["w3"], kp["bias"])

    # (N, 4*Cout, HW) -> (N, Cout, 2H, 2W): de-interleave the 2x2 sub-positions (XLA glue)
    out = out3[:, :, :HW].reshape(N, 2, 2, Cout, H, W)
    out = out.transpose(0, 3, 4, 1, 5, 2).reshape(N, Cout, 2 * H, 2 * W)
    return out


# ----------------------------------------------------------------------------
# Deterministic synthetic parameters (PyTorch-style shapes) + kernel-side packing
# ----------------------------------------------------------------------------
def make_pt_params(key, cin, cinter, cout):
    ks = jax.random.split(key, 8)

    def bn_params(k, c):
        gamma = 1.0 + 0.1 * jax.random.normal(k, (c,), dtype=jnp.float32)
        beta = 0.05 * jnp.arange(c, dtype=jnp.float32)
        mean = 0.02 * jnp.arange(c, dtype=jnp.float32)
        var = 1.0 + 0.01 * jnp.arange(c, dtype=jnp.float32)
        return gamma, beta, mean, var

    return {
        "w_conv_main": 0.2 * jax.random.normal(ks[0], (cout, cin), dtype=jnp.float32),
        "bn_main": bn_params(ks[1], cout),
        "w_conv1": 0.2 * jax.random.normal(ks[2], (cinter, cin), dtype=jnp.float32),
        "bn1": bn_params(ks[3], cinter),
        # ConvTranspose2d weight layout: (in_channels, out_channels, kH, kW)
        "w_tconv": 0.2 * jax.random.normal(ks[4], (cinter, cinter, 2, 2), dtype=jnp.float32),
        "bn2": bn_params(ks[5], cinter),
        "w_conv3": 0.2 * jax.random.normal(ks[6], (cout, cinter), dtype=jnp.float32),
        "bn3": bn_params(ks[7], cout),
    }


def fold_bn(bn):
    gamma, beta, mean, var = bn
    scale = gamma / jnp.sqrt(var + BN_EPS)
    return scale, beta - mean * scale


def make_kernel_params(P):
    cinter = P["w_conv1"].shape[0]
    cout = P["w_conv_main"].shape[0]
    sm, bm = fold_bn(P["bn_main"])
    s1, b1 = fold_bn(P["bn1"])
    s2, b2 = fold_bn(P["bn2"])
    s3, b3 = fold_bn(P["bn3"])

    # fold BN scales into the output-channel rows of each weight
    wm = P["w_conv_main"] * sm[:, None]                      # (Cout, Cin)
    w1 = P["w_conv1"] * s1[:, None]                          # (Cinter, Cin)
    w01 = jnp.concatenate([wm, w1], axis=0)                  # (Cout+Cinter, Cin)

    # ConvTranspose2d weight (Cin, Cout, 2, 2) -> stacked (4*Cinter, Cinter),
    # row = (a*2+b)*Cinter + o, col = ci
    wt = P["w_tconv"].transpose(2, 3, 1, 0).reshape(4 * cinter, cinter)
    wt = wt * jnp.tile(s2, 4)[:, None]

    # conv3 + BN3 as a block-diagonal matrix over the 4 sub-positions
    w3s = P["w_conv3"] * s3[:, None]                         # (Cout, Cinter)
    w3bd = jnp.kron(jnp.eye(4, dtype=w3s.dtype), w3s)        # (4*Cout, 4*Cinter)

    bias = jnp.concatenate([bm, b1, jnp.tile(b2, 4), jnp.tile(b3, 4)], axis=0)[:, None]

    return {
        "w01": w01.astype(jnp.bfloat16),
        "wt": wt.astype(jnp.bfloat16),
        "w3": w3bd.astype(jnp.bfloat16),
        "bias": bias.astype(jnp.float32),
    }


# ----------------------------------------------------------------------------
# Pure-JAX f32 reference (NCHW, scatter-based MaxUnpool) for verification
# ----------------------------------------------------------------------------
def reference_forward(x, indices, P):
    def bn(t, params):
        g, b, m, v = params
        sh = (1, -1, 1, 1)
        return (t - m.reshape(sh)) / jnp.sqrt(v.reshape(sh) + BN_EPS) * g.reshape(sh) + b.reshape(sh)

    def conv1x1(t, w):  # w: (Cout, Cin)
        return jnp.einsum("nihw,oi->nohw", t, w)

    # main branch + MaxUnpool2d scatter
    out_up = bn(conv1x1(x, P["w_conv_main"]), P["bn_main"])
    N, C, H, W = out_up.shape
    Ho, Wo = 2 * H, 2 * W
    flat = jnp.zeros((N, C, Ho * Wo), out_up.dtype)
    n_i = jnp.arange(N)[:, None, None]
    c_i = jnp.arange(C)[None, :, None]
    flat = flat.at[n_i, c_i, indices.reshape(N, C, H * W)].set(out_up.reshape(N, C, H * W))
    out_up = flat.reshape(N, C, Ho, Wo)

    # ext branch
    y = _rrelu(bn(conv1x1(x, P["w_conv1"]), P["bn1"]))
    t = jnp.einsum("nihw,ioab->nohwab", y, P["w_tconv"])
    t = t.transpose(0, 1, 2, 4, 3, 5).reshape(N, y.shape[1], Ho, Wo)
    t = _rrelu(bn(t, P["bn2"]))
    ext = bn(conv1x1(t, P["w_conv3"]), P["bn3"])
    # Dropout2d(0.1) is identity in eval mode
    return _rrelu(out_up + ext)


if __name__ == "__main__":
    key = jax.random.PRNGKey(0)
    N, Cin, H, W = 2, 16, 32, 32
    Cinter, Cout = 8, 8

    kx, kidx, kparam = jax.random.split(key, 3)
    x = jax.random.normal(kx, (N, Cin, H, W), dtype=jnp.float32)

    # max_indices as produced by MaxPool2d(2, return_indices=True): flat index into the
    # (2H, 2W) plane, one per 2x2 window, lying inside that window.
    offs = jax.random.randint(kidx, (N, Cout, H, W, 2), 0, 2)
    ii = jnp.arange(H)[:, None]
    jj = jnp.arange(W)[None, :]
    max_indices = ((2 * ii + offs[..., 0]) * (2 * W) + (2 * jj + offs[..., 1])).astype(jnp.int32)

    P = make_pt_params(kparam, Cin, Cinter, Cout)
    KP = make_kernel_params(P)

    out = upsampling_bottleneck(x, max_indices, KP, tm=512)
    out = jax.block_until_ready(out)

    ref = reference_forward(x, max_indices, P)
    # bf16 MXU operands with f32 accumulation vs pure-f32 reference
    np.testing.assert_allclose(np.asarray(out), np.asarray(ref), atol=5e-2, rtol=5e-2)
    print("KERNEL_OK")
</pallas_src>

<mosaic_0001>
module attributes {stable_mosaic.version = 11 : i64} {
  func.func @_upsampling_bottleneck_kernel(%arg0: i32, %arg1: i32, %arg2: memref<1x16x512xbf16, #tpu.memory_space<vmem>>, %arg3: memref<1x8x512xi32, #tpu.memory_space<vmem>>, %arg4: memref<16x16xbf16, #tpu.memory_space<vmem>>, %arg5: memref<32x8xbf16, #tpu.memory_space<vmem>>, %arg6: memref<32x32xbf16, #tpu.memory_space<vmem>>, %arg7: memref<80x1xf32, #tpu.memory_space<vmem>>, %arg8: memref<1x32x512xf32, #tpu.memory_space<vmem>>) attributes {dimension_semantics = [#tpu.dimension_semantics<parallel>, #tpu.dimension_semantics<parallel>], iteration_bounds = array<i64: 2, 2>, scalar_prefetch = 0 : i64, scratch_operands = 0 : i64, tpu.core_type = #tpu.core_type<tc>, window_params = [{transform_indices = @transform_0, window_bounds = array<i64: 1, 16, 512>}, {transform_indices = @transform_1, window_bounds = array<i64: 1, 8, 512>}, {pipeline_mode = #tpu.pipeline_mode<synchronous>, transform_indices = @transform_2, window_bounds = array<i64: 16, 16>}, {pipeline_mode = #tpu.pipeline_mode<synchronous>, transform_indices = @transform_3, window_bounds = array<i64: 32, 8>}, {pipeline_mode = #tpu.pipeline_mode<synchronous>, transform_indices = @transform_4, window_bounds = array<i64: 32, 32>}, {pipeline_mode = #tpu.pipeline_mode<synchronous>, transform_indices = @transform_5, window_bounds = array<i64: 80, 1>}, {transform_indices = @transform_6, window_bounds = array<i64: 1, 32, 512>}]} {
    %c0 = arith.constant 0 : index
    %c0_0 = arith.constant 0 : index
    %c0_1 = arith.constant 0 : index
    %0 = vector.load %arg2[%c0, %c0_0, %c0_1] : memref<1x16x512xbf16, #tpu.memory_space<vmem>>, vector<1x16x512xbf16>
    %1 = vector.shape_cast %0 : vector<1x16x512xbf16> to vector<16x512xbf16>
    %c0_2 = arith.constant 0 : index
    %c0_3 = arith.constant 0 : index
    %c0_4 = arith.constant 0 : index
    %2 = vector.load %arg3[%c0_2, %c0_3, %c0_4] : memref<1x8x512xi32, #tpu.memory_space<vmem>>, vector<1x8x512xi32>
    %3 = vector.shape_cast %2 : vector<1x8x512xi32> to vector<8x512xi32>
    %c0_5 = arith.constant 0 : index
    %c0_6 = arith.constant 0 : index
    %4 = vector.load %arg7[%c0_5, %c0_6] : memref<80x1xf32, #tpu.memory_space<vmem>>, vector<80x1xf32>
    %5 = vector.extract_strided_slice %4 {offsets = [0, 0], sizes = [16, 1], strides = [1, 1]} : vector<80x1xf32> to vector<16x1xf32>
    %6 = vector.extract_strided_slice %4 {offsets = [16, 0], sizes = [32, 1], strides = [1, 1]} : vector<80x1xf32> to vector<32x1xf32>
    %7 = vector.extract_strided_slice %4 {offsets = [48, 0], sizes = [32, 1], strides = [1, 1]} : vector<80x1xf32> to vector<32x1xf32>
    %c0_7 = arith.constant 0 : index
    %c0_8 = arith.constant 0 : index
    %8 = vector.load %arg4[%c0_7, %c0_8] : memref<16x16xbf16, #tpu.memory_space<vmem>>, vector<16x16xbf16>
    %cst = arith.constant dense<0.000000e+00> : vector<16x512xf32>
    %9 = tpu.matmul %8, %1, %cst {dimension_numbers = #tpu.dot_dimension_numbers<[1], [0], [0], [1], [0, 0, 1, 1], [], []>} : vector<16x16xbf16>, vector<16x512xbf16>, vector<16x512xf32> -> vector<16x512xf32>
    %10 = vector.broadcast %5 : vector<16x1xf32> to vector<16x512xf32>
    %11 = arith.addf %9, %10 : vector<16x512xf32>
    %12 = vector.extract_strided_slice %11 {offsets = [0, 0], sizes = [8, 512], strides = [1, 1]} : vector<16x512xf32> to vector<8x512xf32>
    %13 = vector.extract_strided_slice %11 {offsets = [8, 0], sizes = [8, 512], strides = [1, 1]} : vector<16x512xf32> to vector<8x512xf32>
    %cst_9 = arith.constant 0.000000e+00 : f32
    %14 = vector.broadcast %cst_9 : f32 to vector<8x512xf32>
    %15 = arith.cmpf oge, %13, %14 : vector<8x512xf32>
    %cst_10 = arith.constant 0.229166672 : f32
    %16 = vector.broadcast %cst_10 : f32 to vector<8x512xf32>
    %17 = arith.mulf %13, %16 : vector<8x512xf32>
    %18 = arith.select %15, %13, %17 : vector<8x512xi1>, vector<8x512xf32>
    %c0_11 = arith.constant 0 : index
    %c0_12 = arith.constant 0 : index
    %19 = vector.load %arg5[%c0_11, %c0_12] : memref<32x8xbf16, #tpu.memory_space<vmem>>, vector<32x8xbf16>
    %20 = arith.truncf %18 : vector<8x512xf32> to vector<8x512xbf16>
    %cst_13 = arith.constant dense<0.000000e+00> : vector<32x512xf32>
    %21 = tpu.matmul %19, %20, %cst_13 {dimension_numbers = #tpu.dot_dimension_numbers<[1], [0], [0], [1], [0, 0, 1, 1], [], []>} : vector<32x8xbf16>, vector<8x512xbf16>, vector<32x512xf32> -> vector<32x512xf32>
    %22 = vector.broadcast %6 : vector<32x1xf32> to vector<32x512xf32>
    %23 = arith.addf %21, %22 : vector<32x512xf32>
    %cst_14 = arith.constant 0.000000e+00 : f32
    %24 = vector.broadcast %cst_14 : f32 to vector<32x512xf32>
    %25 = arith.cmpf oge, %23, %24 : vector<32x512xf32>
    %cst_15 = arith.constant 0.229166672 : f32
    %26 = vector.broadcast %cst_15 : f32 to vector<32x512xf32>
    %27 = arith.mulf %23, %26 : vector<32x512xf32>
    %28 = arith.select %25, %23, %27 : vector<32x512xi1>, vector<32x512xf32>
    %c0_16 = arith.constant 0 : index
    %c0_17 = arith.constant 0 : index
    %29 = vector.load %arg6[%c0_16, %c0_17] : memref<32x32xbf16, #tpu.memory_space<vmem>>, vector<32x32xbf16>
    %30 = arith.truncf %28 : vector<32x512xf32> to vector<32x512xbf16>
    %cst_18 = arith.constant dense<0.000000e+00> : vector<32x512xf32>
    %31 = tpu.matmul %29, %30, %cst_18 {dimension_numbers = #tpu.dot_dimension_numbers<[1], [0], [0], [1], [0, 0, 1, 1], [], []>} : vector<32x32xbf16>, vector<32x512xbf16>, vector<32x512xf32> -> vector<32x512xf32>
    %32 = vector.broadcast %7 : vector<32x1xf32> to vector<32x512xf32>
    %33 = arith.addf %31, %32 : vector<32x512xf32>
    %c0_i32 = arith.constant 0 : i32
    %34 = vector.broadcast %c0_i32 : i32 to vector<8x512xi32>
    %35 = arith.cmpi eq, %3, %34 : vector<8x512xi32>
    %cst_19 = arith.constant 0.000000e+00 : f32
    %36 = vector.broadcast %cst_19 : f32 to vector<8x512xf32>
    %37 = arith.select %35, %12, %36 : vector<8x512xi1>, vector<8x512xf32>
    %38 = vector.extract_strided_slice %33 {offsets = [0, 0], sizes = [8, 512], strides = [1, 1]} : vector<32x512xf32> to vector<8x512xf32>
    %39 = arith.addf %37, %38 : vector<8x512xf32>
    %cst_20 = arith.constant 0.000000e+00 : f32
    %40 = vector.broadcast %cst_20 : f32 to vector<8x512xf32>
    %41 = arith.cmpf oge, %39, %40 : vector<8x512xf32>
    %cst_21 = arith.constant 0.229166672 : f32
    %42 = vector.broadcast %cst_21 : f32 to vector<8x512xf32>
    %43 = arith.mulf %39, %42 : vector<8x512xf32>
    %44 = arith.select %41, %39, %43 : vector<8x512xi1>, vector<8x512xf32>
    %c0_22 = arith.constant 0 : index
    %c0_23 = arith.constant 0 : index
    %c0_24 = arith.constant 0 : index
    %45 = vector.load %arg8[%c0_22, %c0_23, %c0_24] : memref<1x32x512xf32, #tpu.memory_space<vmem>>, vector<1x8x512xf32>
    %46 = vector.shape_cast %45 : vector<1x8x512xf32> to vector<8x512xf32>
    %47 = vector.shape_cast %44 : vector<8x512xf32> to vector<1x8x512xf32>
    tpu.vector_store %arg8[%c0_22, %c0_23, %c0_24], %47 {strides = array<i32>} : memref<1x32x512xf32, #tpu.memory_space<vmem>>, vector<1x8x512xf32>,
    %c1_i32 = arith.constant 1 : i32
    %48 = vector.broadcast %c1_i32 : i32 to vector<8x512xi32>
    %49 = arith.cmpi eq, %3, %48 : vector<8x512xi32>
    %cst_25 = arith.constant 0.000000e+00 : f32
    %50 = vector.broadcast %cst_25 : f32 to vector<8x512xf32>
    %51 = arith.select %49, %12, %50 : vector<8x512xi1>, vector<8x512xf32>
    %52 = vector.extract_strided_slice %33 {offsets = [8, 0], sizes = [8, 512], strides = [1, 1]} : vector<32x512xf32> to vector<8x512xf32>
    %53 = arith.addf %51, %52 : vector<8x512xf32>
    %cst_26 = arith.constant 0.000000e+00 : f32
    %54 = vector.broadcast %cst_26 : f32 to vector<8x512xf32>
    %55 = arith.cmpf oge, %53, %54 : vector<8x512xf32>
    %cst_27 = arith.constant 0.229166672 : f32
    %56 = vector.broadcast %cst_27 : f32 to vector<8x512xf32>
    %57 = arith.mulf %53, %56 : vector<8x512xf32>
    %58 = arith.select %55, %53, %57 : vector<8x512xi1>, vector<8x512xf32>
    %c0_28 = arith.constant 0 : index
    %c8 = arith.constant 8 : index
    %c0_29 = arith.constant 0 : index
    %59 = vector.load %arg8[%c0_28, %c8, %c0_29] : memref<1x32x512xf32, #tpu.memory_space<vmem>>, vector<1x8x512xf32>
    %60 = vector.shape_cast %59 : vector<1x8x512xf32> to vector<8x512xf32>
    %61 = vector.shape_cast %58 : vector<8x512xf32> to vector<1x8x512xf32>
    tpu.vector_store %arg8[%c0_28, %c8, %c0_29], %61 {strides = array<i32>} : memref<1x32x512xf32, #tpu.memory_space<vmem>>, vector<1x8x512xf32>,
    %c2_i32 = arith.constant 2 : i32
    %62 = vector.broadcast %c2_i32 : i32 to vector<8x512xi32>
    %63 = arith.cmpi eq, %3, %62 : vector<8x512xi32>
    %cst_30 = arith.constant 0.000000e+00 : f32
    %64 = vector.broadcast %cst_30 : f32 to vector<8x512xf32>
    %65 = arith.select %63, %12, %64 : vector<8x512xi1>, vector<8x512xf32>
    %66 = vector.extract_strided_slice %33 {offsets = [16, 0], sizes = [8, 512], strides = [1, 1]} : vector<32x512xf32> to vector<8x512xf32>
    %67 = arith.addf %65, %66 : vector<8x512xf32>
    %cst_31 = arith.constant 0.000000e+00 : f32
    %68 = vector.broadcast %cst_31 : f32 to vector<8x512xf32>
    %69 = arith.cmpf oge, %67, %68 : vector<8x512xf32>
    %cst_32 = arith.constant 0.229166672 : f32
    %70 = vector.broadcast %cst_32 : f32 to vector<8x512xf32>
    %71 = arith.mulf %67, %70 : vector<8x512xf32>
    %72 = arith.select %69, %67, %71 : vector<8x512xi1>, vector<8x512xf32>
    %c0_33 = arith.constant 0 : index
    %c16 = arith.constant 16 : index
    %c0_34 = arith.constant 0 : index
    %73 = vector.load %arg8[%c0_33, %c16, %c0_34] : memref<1x32x512xf32, #tpu.memory_space<vmem>>, vector<1x8x512xf32>
    %74 = vector.shape_cast %73 : vector<1x8x512xf32> to vector<8x512xf32>
    %75 = vector.shape_cast %72 : vector<8x512xf32> to vector<1x8x512xf32>
    tpu.vector_store %arg8[%c0_33, %c16, %c0_34], %75 {strides = array<i32>} : memref<1x32x512xf32, #tpu.memory_space<vmem>>, vector<1x8x512xf32>,
    %c3_i32 = arith.constant 3 : i32
    %76 = vector.broadcast %c3_i32 : i32 to vector<8x512xi32>
    %77 = arith.cmpi eq, %3, %76 : vector<8x512xi32>
    %cst_35 = arith.constant 0.000000e+00 : f32
    %78 = vector.broadcast %cst_35 : f32 to vector<8x512xf32>
    %79 = arith.select %77, %12, %78 : vector<8x512xi1>, vector<8x512xf32>
    %80 = vector.extract_strided_slice %33 {offsets = [24, 0], sizes = [8, 512], strides = [1, 1]} : vector<32x512xf32> to vector<8x512xf32>
    %81 = arith.addf %79, %80 : vector<8x512xf32>
    %cst_36 = arith.constant 0.000000e+00 : f32
    %82 = vector.broadcast %cst_36 : f32 to vector<8x512xf32>
    %83 = arith.cmpf oge, %81, %82 : vector<8x512xf32>
    %cst_37 = arith.constant 0.229166672 : f32
    %84 = vector.broadcast %cst_37 : f32 to vector<8x512xf32>
    %85 = arith.mulf %81, %84 : vector<8x512xf32>
    %86 = arith.select %83, %81, %85 : vector<8x512xi1>, vector<8x512xf32>
    %c0_38 = arith.constant 0 : index
    %c24 = arith.constant 24 : index
    %c0_39 = arith.constant 0 : index
    %87 = vector.load %arg8[%c0_38, %c24, %c0_39] : memref<1x32x512xf32, #tpu.memory_space<vmem>>, vector<1x8x512xf32>
    %88 = vector.shape_cast %87 : vector<1x8x512xf32> to vector<8x512xf32>
    %89 = vector.shape_cast %86 : vector<8x512xf32> to vector<1x8x512xf32>
    tpu.vector_store %arg8[%c0_38, %c24, %c0_39], %89 {strides = array<i32>} : memref<1x32x512xf32, #tpu.memory_space<vmem>>, vector<1x8x512xf32>,
    return
  }
  func.func @transform_0(%arg0: i32, %arg1: i32) -> (i32, i32, i32) {
    %c0_i32 = arith.constant 0 : i32
    %c0_i32_0 = arith.constant 0 : i32
    return %arg0, %c0_i32, %arg1 : i32, i32, i32
  }
  func.func @transform_1(%arg0: i32, %arg1: i32) -> (i32, i32, i32) {
    %c0_i32 = arith.constant 0 : i32
    %c0_i32_0 = arith.constant 0 : i32
    return %arg0, %c0_i32, %arg1 : i32, i32, i32
  }
  func.func @transform_2(%arg0: i32, %arg1: i32) -> (i32, i32) {
    %c0_i32 = arith.constant 0 : i32
    %c0_i32_0 = arith.constant 0 : i32
    %c0_i32_1 = arith.constant 0 : i32
    return %c0_i32, %c0_i32_0 : i32, i32
  }
  func.func @transform_3(%arg0: i32, %arg1: i32) -> (i32, i32) {
    %c0_i32 = arith.constant 0 : i32
    %c0_i32_0 = arith.constant 0 : i32
    %c0_i32_1 = arith.constant 0 : i32
    return %c0_i32, %c0_i32_0 : i32, i32
  }
  func.func @transform_4(%arg0: i32, %arg1: i32) -> (i32, i32) {
    %c0_i32 = arith.constant 0 : i32
    %c0_i32_0 = arith.constant 0 : i32
    %c0_i32_1 = arith.constant 0 : i32
    return %c0_i32, %c0_i32_0 : i32, i32
  }
  func.func @transform_5(%arg0: i32, %arg1: i32) -> (i32, i32) {
    %c0_i32 = arith.constant 0 : i32
    %c0_i32_0 = arith.constant 0 : i32
    %c0_i32_1 = arith.constant 0 : i32
    return %c0_i32, %c0_i32_0 : i32, i32
  }
  func.func @transform_6(%arg0: i32, %arg1: i32) -> (i32, i32, i32) {
    %c0_i32 = arith.constant 0 : i32
    %c0_i32_0 = arith.constant 0 : i32
    return %arg0, %c0_i32, %arg1 : i32, i32, i32
  }
}

</mosaic_0001>

<bundles_post_ra>
// kernel: tpu_custom_call.1
= control target key start
LH: loop header
LB: loop body
LE: loop exit
PB: predicated region body
PF: predicated region fallthrough
CT: control target
= control target key end

     0   :  { %s1866_s0 = inlined_call_operand.hbm [shape: bf16[2,16,1024], index: 0, kind: input, shape index: {}]   ;;  %s1867_s1 = inlined_call_operand.hbm [shape: s32[2,8,1024], index: 1, kind: input, shape index: {}]   ;;  %s1868_s2 = inlined_call_operand.vmem [shape: bf16[16,16], index: 2, kind: input, shape index: {}]   ;;  %s1869_s3 = inlined_call_operand.vmem [shape: bf16[32,8], index: 3, kind: input, shape index: {}]   ;;  %s1870_s4 = inlined_call_operand.vmem [shape: bf16[32,32], index: 4, kind: input, shape index: {}]   ;;  %s1871_s5 = inlined_call_operand.vmem [shape: f32[80,1], index: 5, kind: input, shape index: {}]   ;;  %s1872_s6 = inlined_call_operand.hbm [shape: f32[2,32,1024], index: 6, kind: output, shape index: {}]  }
   0x1   :  { %1884 = sst [smem:[#allocation18_spill]] %s1866_s0 }
   0x2   :  { %1885 = sst [smem:[#allocation19_spill]] %s1872_s6 }
   0x3   :  { %11 = vsyncpa [#allocation3], 0 }
   0x4   :  { %13 = vsyncpa [#allocation3 + $0x1], 0 }
   0x5   :  { %14 = vsyncpa [#allocation6], 0 }
   0x6   :  { %16 = vsyncpa [#allocation6 + $0x1], 0 }
   0x7   :  { %17 = vsyncpa [#allocation4], 0 }
   0x8   :  { %19 = vsyncpa [#allocation4 + $0x1], 0  ;;  %s1457_s21 = smov 0   ;;  %s1459_s22 = smov 0  }
   0x9   :  { %s1461_s23 = smov 0   ;;  %s1463_s24 = smov 0  }
   0xa   :  { %s1465_s25 = smov 0   ;;  %s1467_s26 = smov 0  }
   0xb   :  { %s1469_s27 = smov 0   ;;  %s1471_s28 = smov 0  }
   0xc LB: > { %1886 = sst [smem:[#allocation11_spill]] %s1382_s21  ;;  %s1102_s29 = sadd.s32 4294967295, %s1410_s28   ;;  %s1410_s28 = sphi %s1471_s28, %s25_s28   ;;  %s1406_s27 = sphi %s1469_s27, %s1919_s27   ;;  %s1402_s26 = sphi %s1467_s26, %s1918_s26   ;;  %s1398_s25 = sphi %s1465_s25, %s1917_s25   ;;  %s1394_s24 = sphi %s1463_s24, %s1916_s24   ;;  %s1390_s23 = sphi %s1461_s23, %s1911_s23   ;;  %s1386_s22 = sphi %s1459_s22, %s1915_s22   ;;  %s1382_s21 = sphi %s1457_s21, %s1914_s21  }
   0xd   : > { %1887 = sst [smem:[#allocation12_spill]] %s1390_s23  ;;  %s1103_s30 = sadd.s32 4294967294, %s1410_s28  }
   0xe   : > { %s34_s7 = sadd.s32 1, %s1402_s26  ;;  %s37_s8 = sadd.s32 1, %s1406_s27 }
   0xf   : > { %p35_p0 = scmp.ge.s32.totalorder %s34_s7, 2  ;;  %s46_s9 = sadd.s32 1, %s1390_s23 }
  0x10   : > { %p53_p1 = scmp.ne.s32.totalorder %s1390_s23, %s1386_s22  ;;  %p54_p2 = scmp.eq.s32.totalorder %s1410_s28, 0 }
  0x11   : > { %s1921_s7 = smov (%p35_p0, %s34_s7), 0  ;;  %s1923_s8 = smov (!%p35_p0, %s37_s8), %s1406_s27 }
  0x12   : > { %1888 = sst [smem:[#allocation13_spill]] %s1921_s7  ;;  %s42_s10 = ssub.s32 %s1402_s26, %s1921_s7 }
  0x13   : > { %p1510_p3 = por %p54_p2, %p53_p1  ;;  %p39_p4 = scmp.ge.s32.totalorder %s1923_s8, 2 }
  0x14   : > { %p59_p5 = scmp.ne.s32.totalorder %s1386_s22, %s1382_s21  ;;  %p60_p6 = scmp.eq.s32.totalorder %s1102_s29, 0 }
  0x15   : > { %p197_p7 = scmp.eq.s32.totalorder %s1102_s29, 3  ;;  %s1925_s8 = smov (%p39_p4, %s1923_s8), 0 }
  0x16   : > { %1890 = sst [smem:[#allocation14_spill]] %s1925_s8  ;;  %p1518_p8 = por %p60_p6, %p59_p5 }
  0x17   : > { %p1522_p9 = por %p197_p7, %p53_p1  ;;  %s41_s14 = ssub.s32 %s1406_s27, %s1925_s8 }
  0x18   : > { %s1891_s12 = scalar_select %p1518_p8, 1, 0 }
  0x19   : > { %s1892_s13 = scalar_select %p1522_p9, 1, 0 }
  0x1a   : > { %p203_p10 = scmp.eq.s32.totalorder %s1103_s30, 3  ;;  %s43_s15 = sor.u32 %s42_s10, %s41_s14 }
  0x1b   : > { %1893 = sst [smem:[#allocation15_spill]] %s1892_s13  ;;  %p44_p11 = scmp.eq.s32.totalorder %s43_s15, 0 }
  0x1c   : > { %p1528_p12 = por %p203_p10, %p59_p5  ;;  %p1162_p13 = scmp.lt.s32.totalorder %s1410_s28, 4 }
  0x1d   : > { %s1534_s17 = sand.u32 1, %s1390_s23   ;;  %s1107_s20 = sshll.u32 %s1402_s26, 2 }
  0x1e   : > { %s1894_s16 = scalar_select %p1528_p12, 1, 0 }
  0x1f   : > { %s1537_s18 = scalar_select %p44_p11, %s1390_s23, %s46_s9  }
  0x20   : > { %1895 = sst [smem:[#allocation16_spill]] %s1894_s16  ;;  %s1876_s19 = sshll.u32 %s1534_s17, 5 }
  0x21   : > { %1896 = sst [smem:[#allocation17_spill]] %s1537_s18  ;;  %s1108_s29 = sshll.u32 %s1406_s27, 4 }
  0x22   : > { %s239_s30 = scalar_lea.vmem [#allocation2], %s1876_s19  ;;  %s245_s14 = sadd.s32 %s1108_s29, %s1107_s20 }
  0x23   : > { %s248_s10 = sshll.u32 %s239_s30, 4  ;;  %s1109_s15 = sshll.u32 %s245_s14, 6  ;;  %s1546_s10 = int_to_ptr.vmem [resolvable:$true] %s248_s10 }
  0x24   : > { %p1550_p0 = pnand %p1162_p13, %p1510_p3  ;;  %s1898_s0 = sld [smem:[#allocation18_spill]] }
  0x25   : > { %s236_s29 = scalar_lea.sflag [#allocation3], %s1534_s17 }
  0x26   : > { %p1250_p3 = pneg %p1550_p0 }
  0x2a   : > { %s1557_s9 = scalar_lea.hbm %s1898_s0, %s1109_s15  ;;  %s1253_s16 = scalar_lea.hbm %s1898_s0, 2048 }
  0x2b   : > { %s1248_s30 = scalar_lea.hbm %s1557_s9, 512  ;;  %p1254_p6 = scmp.lt.u32.totalorder %s1557_s9, %s1898_s0 }
  0x2c   : > { %p1249_p2 = scmp.ne.s32.totalorder %s1557_s9, %s1248_s30  ;;  %p1255_p7 = scmp.lt.u32.totalorder %s1253_s16, %s1248_s30 }
  0x2d   : > { %p1257_p11 = scmp.lt.u32.totalorder %s1248_s30, %s1557_s9 }
  0x2e   : > { %p1251_p4 = pnand %p1250_p3, %p1249_p2  ;;  %p1256_p10 = por %p1255_p7, %p1254_p6 }
  0x30   : > { %p1252_p5 = pneg %p1251_p4  ;;  %p1258_p13 = por %p1257_p11, %p1256_p10 }
  0x32   : > { %p1259_p1 = pnand %p1258_p13, %p1252_p5 }
  0x34   : > { %1262 = shalt.err (!%p1259_p1)
}
  0x35   : > { %s1263_s19 = scalar_lea.vmem %s1546_s10, 512  ;;  %s1412_s11 = smov [#allocation2]  }
  0x36   : > { %p1264_p2 = scmp.ne.s32.totalorder %s1546_s10, %s1263_s19  ;;  %s1268_s7 = sshll.u32 %s1412_s11, 4  ;;  %s1269_s7 = int_to_ptr.vmem [resolvable:$false] %s1268_s7 }
  0x37   : > { %s1270_s14 = scalar_lea.vmem %s1269_s7, 1024  ;;  %p1271_p9 = scmp.lt.s32.totalorder %s1546_s10, %s1269_s7 }
  0x38   : > { %p1266_p4 = pnand %p1264_p2, %p1250_p3  ;;  %p1272_p6 = scmp.lt.s32.totalorder %s1270_s14, %s1263_s19 }
  0x3a   : > { %p1267_p12 = pneg %p1266_p4  ;;  %p1273_p7 = por %p1272_p6, %p1271_p9 }
  0x3c   : > { %p1274_p10 = pnand %p1273_p7, %p1267_p12 }
  0x3e   : > { %1277 = shalt.err (!%p1274_p10)
}
  0x3f   : > { %s1413_s30 = smov 512   ;;  %s1414_s16 = smov 256  }
  0x40   : > { %s1415_s15 = smov 16   ;;  %p277_p9 = scmp.lt.s32.totalorder %s1410_s28, 5 }
  0x41   : > { %1154 = dma.hbm_to_vmem [thread:$0]  (!%p1550_p0), %s1557_s9, 512, %s1546_s10, %s236_s29, %s1413_s30, %s1414_s16, %s1415_s15  }
  0x42   : > { %s1112_s19 = sshll.u32 %s1406_s27, 3  ;;  %p1899_p12 = scmp.ge.s32.totalorder %s1410_s28, 1 }
  0x43   : > { %s268_s7 = sadd.s32 %s1112_s19, %s1107_s20  ;;  %s1901_s0 = sshll.u32 %s1534_s17, 5 }
  0x44   : > { %p1592_p1 = pnand %p1899_p12, %p277_p9  ;;  %s1113_s14 = sshll.u32 %s268_s7, 7 }
  0x45   : > { %s262_s18 = scalar_lea.vmem [#allocation5], %s1901_s0  ;;  %s1603_s13 = scalar_lea.hbm %s1867_s1, %s1113_s14 }
  0x46   : > { %s1900_s11 = scalar_select %p1592_p1, 1, 0 }
  0x47   : > { %s272_s23 = sshll.u32 %s262_s18, 4  ;;  %s259_s10 = scalar_lea.sflag [#allocation6], %s1534_s17  ;;  %s273_s23 = int_to_ptr.vmem [resolvable:$true] %s272_s23 }
  0x48   : > { %s1278_s9 = scalar_lea.hbm %s1603_s13, 512  ;;  %s1283_s18 = scalar_lea.hbm %s1867_s1, 2048 }
  0x49   : > { %p1279_p5 = scmp.ne.s32.totalorder %s1603_s13, %s1278_s9  ;;  %p1284_p2 = scmp.lt.u32.totalorder %s1603_s13, %s1867_s1 }
  0x4a   : > { %p1285_p4 = scmp.lt.u32.totalorder %s1283_s18, %s1278_s9  ;;  %p1287_p7 = scmp.lt.u32.totalorder %s1278_s9, %s1603_s13 }
  0x4b   : > { %p1281_p11 = pnand %p1279_p5, %p1250_p3 }
  0x4c   : > { %p1286_p6 = por %p1285_p4, %p1284_p2 }
  0x4d   : > { %p1282_p13 = pneg %p1281_p11 }
  0x4e   : > { %p1288_p10 = por %p1287_p7, %p1286_p6 }
  0x50   : > { %p1289_p9 = pnand %p1288_p10, %p1282_p13 }
  0x52   : > { %1292 = shalt.err (!%p1289_p9)
}
  0x53   : > { %s1293_s21 = scalar_lea.vmem %s273_s23, 512  ;;  %s1416_s17 = smov [#allocation5]  }
  0x54   : > { %p1294_p12 = scmp.ne.s32.totalorder %s273_s23, %s1293_s21  ;;  %s1298_s30 = sshll.u32 %s1416_s17, 4  ;;  %s1299_s30 = int_to_ptr.vmem [resolvable:$false] %s1298_s30 }
  0x55   : > { %s1300_s16 = scalar_lea.vmem %s1299_s30, 1024  ;;  %p1301_p8 = scmp.lt.s32.totalorder %s273_s23, %s1299_s30 }
  0x56   : > { %p1296_p5 = pnand %p1294_p12, %p1250_p3  ;;  %p1302_p1 = scmp.lt.s32.totalorder %s1300_s16, %s1293_s21 }
  0x58   : > { %p1297_p11 = pneg %p1296_p5  ;;  %p1303_p2 = por %p1302_p1, %p1301_p8 }
  0x5a   : > { %p1304_p4 = pnand %p1303_p2, %p1297_p11 }
  0x5c   : > { %1307 = shalt.err (!%p1304_p4)
}
  0x5d   : > { %1157 = dma.hbm_to_vmem [thread:$0]  (!%p1550_p0), %s1603_s13, 512, %s273_s23, %s259_s10  }
  0x5e   : > { %p1902_p13 = scmp.ne.s32.totalorder %s1900_s11, 0 }
  0x5f   : > { %s1628_s15 = sand.u32 (!%p1902_p13), 1, %s1386_s22   ;;  %p1903_p3 = scmp.ne.s32.totalorder (!%p1902_p13), %s1891_s12, 0 }
  0x60   : > { %281 = sbr.rel (%p1902_p13) target bundleno = 828 (0x33c), region = 44  ;;  %s1115_s19 = sshll.u32 (!%p1902_p13), %s1628_s15, 5 }
  0x61   : > { %s284_s7 = scalar_lea.sflag (!%p1902_p13), [#allocation3], %s1628_s15  ;;  %s287_s14 = scalar_lea.vmem (!%p1902_p13), [#allocation2], %s1115_s19 }
  0x67   : > { %1369 = dma.done.wait (%p1903_p3), %s284_s7, 512  }
  0x68   : > { %1371 = vsyncadd (%p1903_p3), %s284_s7, 4294966784  ;;  %s293_s23 = scalar_lea.sflag [#allocation6], %s1628_s15  ;;  %s1637_s8 = scalar_lea.vmem [#allocation5], %s1115_s19 }
  0x69   : > { %1373 = dma.done.wait (%p1903_p3), %s293_s23, 512  }
  0x6a   : > { %1375 = vsyncadd (%p1903_p3), %s293_s23, 4294966784  ;;  %v1417_v0 = vmov 0   ;;  %v1237_v1 = vld [vmem:[%s287_s14 + $0x4] ss:$16 sps:$4 sm:$0xff]   ;;  %v1239_v2 = vld [vmem:[%s287_s14 + $0xc] ss:$16 sps:$4 sm:$0xff]  }
  0x6b   : > { %425 = vmatprep.mubr.bf16.mxu0 %v1417_v0  ;;  %468 = vmatprep.mubr.bf16.mxu1 %v1417_v0  ;;  %v1241_v3 = vld [vmem:[%s287_s14] ss:$16 sps:$4 sm:$0xff]   ;;  %v1242_v4 = vld [vmem:[%s287_s14 + $0x8] ss:$16 sps:$4 sm:$0xff]   ;;  %vm389_vm0 = vcmask 130048   ;;  %vm536_vm5 = vcmask 1043456  }
  0x6c   : > { %1235 = vset.pattern.permute.xlu0 %v1417_v0  ;;  %1236 = vset.pattern.permute.xlu1 %v1417_v0  ;;  %v1243_v5 = vld [vmem:[%s1868_s2] sm:$0xff]   ;;  %v343_v6 = vld [vmem:[%s1871_s5 + $0x8] sm:$0xff]  ;;  %v345_v7 = vld [vmem:[%s1871_s5 + $0x18] sm:$0xff]  ;;  %vm529_vm6 = vcmask 64512   ;;  %s1140_s16 = sshll.u32 %s1394_s24, 2  ;;  %s1141_s19 = sshll.u32 %s1398_s25, 5 }
  0x6d   : > { %393 = vmatprep.subr.bf16.mxu0 %v1237_v1  ;;  %436 = vmatprep.subr.bf16.mxu1 %v1239_v2  ;;  %v344_v8 = vld [vmem:[%s1871_s5 + $0x10] sm:$0xff]  ;;  %v346_v9 = vld [vmem:[%s1871_s5 + $0x20] sm:$0xff]  ;;  %v347_v10 = vld [vmem:[%s1871_s5 + $0x28] sm:$0xff]  ;;  %s1789_s24 = sadd.s32 %s1141_s19, %s1140_s16  ;;  %s1904_s14 = sld [smem:[#allocation15_spill]] }
  0x6e   : > { %394 = vmatpush1.bf16.msra.mxu0 %v1241_v3  ;;  %437 = vmatpush1.bf16.msra.mxu1 %v1242_v4  ;;  %v342_v11 = vld [vmem:[%s1871_s5] sm:$0xff]  ;;  %v348_v12 = vld [vmem:[%s1871_s5 + $0x30] sm:$0xff]  ;;  %v349_v14 = vld [vmem:[%s1871_s5 + $0x38] sm:$0xff]  ;;  %s1142_s25 = sshll.u32 %s1789_s24, 7  ;;  %s1905_s11 = sld [smem:[#allocation19_spill]] }
  0x6f   : > { %361 = vperm.xlu0 %1235, %v343_v6   ;;  %506 = vperm.xlu1 %1236, %v345_v7   ;;  %v350_v13 = vld [vmem:[%s1871_s5 + $0x40] sm:$0xff]  ;;  %v351_v15 = vld [vmem:[%s1871_s5 + $0x48] sm:$0xff]  ;;  %s971_s10 = scalar_lea.sflag [#allocation4], %s1628_s15  ;;  %s1418_s20 = smov [#allocation7]  }
  0x70   : > { %v1244_v43 = vld [vmem:[%s1869_s3] sm:$0xff]   ;;  %v1245_v44 = vld [vmem:[%s1869_s3 + $0x8] sm:$0xff]   ;;  %s1312_s0 = sshll.u32 %s1418_s20, 4  ;;  %s1313_s0 = int_to_ptr.vmem [resolvable:$false] %s1312_s0 }
  0x71   : > { %1123 = vmatmul.mubr.msk.bf16.vlgmr.msra.gmra.mrb[0].mxu0 %vm389_vm0, %v1243_v5  ;;  %1124 = vmatmul.mubr.msk.bf16.vlgmr.msra.gmra.mrb[0].mxu1 %vm389_vm0, %v1243_v5  ;;  %s1314_s18 = scalar_lea.vmem %s1313_s0, 4096 }
  0x72   : > { %581 = vmatprep.mubr.bf16.mxu0 %v1417_v0  ;;  %634 = vmatprep.mubr.bf16.mxu1 %v1417_v0 }
  0x73   : > { %501 = vperm.xlu0 %1235, %v344_v8   ;;  %511 = vperm.xlu1 %1236, %v346_v9   ;;  %p1906_p0 = scmp.ne.s32.totalorder %s1904_s14, 0 }
  0x74   : > { %s1807_s12 = scalar_lea.hbm %s1905_s11, %s1142_s25 }
  0x77   : > { %516 = vperm.xlu0 %1235, %v347_v10   ;;  %356 = vperm.xlu1 %1236, %v342_v11  }
  0x7b   : > { %717 = vperm.xlu0 %1235, %v348_v12   ;;  %722 = vperm.xlu1 %1236, %v349_v14  }
  0x7f   : > { %727 = vperm.xlu0 %1235, %v350_v13   ;;  %732 = vperm.xlu1 %1236, %v351_v15  }
  0xee   : > { %v362_v16 = vpop.permute.xlu0 %361  ;;  %v507_v46 = vpop.permute.xlu1 %506 }
  0xf2   : > { %v502_v45 = vpop.permute.xlu0 %501  ;;  %v512_v7 = vpop.permute.xlu1 %511 }
 0x144   : > { %v1682_v17 = vpop.f32.mrb[0].mxu0  ;;  %v1684_v18 = vpop.f32.mrb[0].mxu1 }
 0x145   : > { %v1686_v19 = vpop.f32.mrb[1].mxu0  ;;  %v1688_v20 = vpop.f32.mrb[1].mxu1 }
 0x146   : > { %v431_v21 = vpop.f32.mrb[2].mxu0  ;;  %v474_v22 = vpop.f32.mrb[2].mxu1 }
 0x147   : > { %v432_v23 = vadd.f32 %v431_v21, %v362_v16  ;;  %v475_v24 = vadd.f32 %v474_v22, %v362_v16  ;;  %v433_v25 = vpop.f32.mrb[3].mxu0  ;;  %v476_v26 = vpop.f32.mrb[3].mxu1 }
 0x148   : > { %v434_v27 = vadd.f32 %v433_v25, %v362_v16  ;;  %v477_v28 = vadd.f32 %v476_v26, %v362_v16 }
 0x149   : > { %vm479_vm1 = vcmp.ge.f32.partialorder %v432_v23, 0.0  ;;  %v483_v29 = vmul.f32 0.22916667, %v432_v23  ;;  %vm481_vm2 = vcmp.ge.f32.partialorder %v475_v24, 0.0  ;;  %v485_v30 = vmul.f32 0.22916667, %v475_v24 }
 0x14a   : > { %vm480_vm3 = vcmp.ge.f32.partialorder %v434_v27, 0.0  ;;  %v484_v31 = vmul.f32 0.22916667, %v434_v27  ;;  %vm482_vm4 = vcmp.ge.f32.partialorder %v477_v28, 0.0  ;;  %v486_v32 = vmul.f32 0.22916667, %v477_v28 }
 0x14b   : > { %v487_v33 = vsel %vm479_vm1, %v432_v23, %v483_v29  ;;  %v489_v34 = vsel %vm481_vm2, %v475_v24, %v485_v30 }
 0x14c   : > { %v495_v35 = vpack.c.bf16 %v487_v33, %v487_v33  ;;  %v497_v36 = vpack.c.bf16 %v489_v34, %v489_v34  ;;  %v488_v37 = vsel %vm480_vm3, %v434_v27, %v484_v31  ;;  %v490_v38 = vsel %vm482_vm4, %v477_v28, %v486_v32  ;;  %v517_v34 = vpop.permute.xlu0 %516 }
 0x14d   : > { %v496_v39 = vpack.c.bf16 %v488_v37, %v488_v37  ;;  %v498_v40 = vpack.c.bf16 %v490_v38, %v490_v38 }
 0x14e   : > { %v538_v41 = vsel %vm536_vm5, %v495_v35, 0  ;;  %v544_v42 = vsel %vm536_vm5, %v497_v36, 0 }
 0x14f   : > { %1127 = vmatprep.subr.msk.bf16.mxu0 %vm536_vm5, %v496_v39  ;;  %1130 = vmatprep.subr.msk.bf16.mxu1 %vm536_vm5, %v498_v40 }
 0x150   : > { %550 = vmatpush1.bf16.msra.mxu0 %v538_v41  ;;  %603 = vmatpush1.bf16.msra.mxu1 %v544_v42 }
 0x153   : > { %1128 = vmatmul.mubr.msk.bf16.vlgmr.msra.gmra.mrb[4].mxu0 %vm529_vm6, %v1244_v43  ;;  %1131 = vmatmul.mubr.msk.bf16.vlgmr.msra.gmra.mrb[4].mxu1 %vm529_vm6, %v1244_v43 }
 0x154   : > { %591 = vmatprep.mubr.bf16.mxu0 %v1417_v0  ;;  %644 = vmatprep.mubr.bf16.mxu1 %v1417_v0 }
 0x15b   : > { %1129 = vmatmul.mubr.msk.bf16.gmra.mrb[8].mxu0 %vm529_vm6, %v1245_v44  ;;  %1132 = vmatmul.mubr.msk.bf16.gmra.mrb[8].mxu1 %vm529_vm6, %v1245_v44 }
 0x15c   : > { %784 = vmatprep.mubr.bf16.mxu0 %v1417_v0  ;;  %837 = vmatprep.mubr.bf16.mxu1 %v1417_v0 }
 0x226   : > { %v583_v47 = vpop.f32.mrb[4].mxu0  ;;  %v636_v48 = vpop.f32.mrb[4].mxu1 }
 0x227   : > { %v584_v49 = vadd.f32 %v583_v47, %v502_v45  ;;  %v637_v50 = vadd.f32 %v636_v48, %v502_v45  ;;  %v585_v51 = vpop.f32.mrb[5].mxu0  ;;  %v638_v52 = vpop.f32.mrb[5].mxu1 }
 0x228   : > { %v586_v53 = vadd.f32 %v585_v51, %v502_v45  ;;  %v639_v54 = vadd.f32 %v638_v52, %v502_v45  ;;  %v587_v55 = vpop.f32.mrb[6].mxu0  ;;  %v640_v56 = vpop.f32.mrb[6].mxu1 }
 0x229   : > { %vm655_vm7 = vcmp.ge.f32.partialorder %v584_v49, 0.0  ;;  %v671_v57 = vmul.f32 0.22916667, %v584_v49  ;;  %vm657_vm8 = vcmp.ge.f32.partialorder %v637_v50, 0.0  ;;  %v673_v58 = vmul.f32 0.22916667, %v637_v50 }
 0x22a   : > { %vm656_vm9 = vcmp.ge.f32.partialorder %v586_v53, 0.0  ;;  %v672_v59 = vmul.f32 0.22916667, %v586_v53  ;;  %vm658_vm10 = vcmp.ge.f32.partialorder %v639_v54, 0.0  ;;  %v588_v60 = vadd.f32 %v587_v55, %v507_v46  ;;  %v589_v62 = vpop.f32.mrb[7].mxu0  ;;  %v642_v63 = vpop.f32.mrb[7].mxu1 }
 0x22b   : > { %v641_v61 = vadd.f32 %v640_v56, %v507_v46  ;;  %v1700_v1 = vsel %vm655_vm7, %v584_v49, %v671_v57  ;;  %v674_v2 = vmul.f32 0.22916667, %v639_v54  ;;  %v590_v3 = vadd.f32 %v589_v62, %v507_v46  ;;  %v1246_v62 = vld [vmem:[%s1870_s4] sm:$0xff]  }
 0x22c   : > { %v643_v4 = vadd.f32 %v642_v63, %v507_v46  ;;  %vm659_vm11 = vcmp.ge.f32.partialorder %v588_v60, 0.0  ;;  %v675_v5 = vmul.f32 0.22916667, %v588_v60  ;;  %v689_v8 = vsel %vm657_vm8, %v637_v50, %v673_v58  ;;  %v1247_v63 = vld [vmem:[%s1870_s4 + $0x8] sm:$0xff]  }
 0x22d   : > { %vm661_vm12 = vcmp.ge.f32.partialorder %v641_v61, 0.0  ;;  %v677_v6 = vmul.f32 0.22916667, %v641_v61  ;;  %vm660_vm13 = vcmp.ge.f32.partialorder %v590_v3, 0.0  ;;  %v676_v9 = vmul.f32 0.22916667, %v590_v3 }
 0x22e   : > { %v678_v10 = vmul.f32 0.22916667, %v643_v4  ;;  %v691_v11 = vsel %vm659_vm11, %v588_v60, %v675_v5  ;;  %vm662_vm14 = vcmp.ge.f32.partialorder %v643_v4, 0.0  ;;  %v593_v13 = vpop.f32.mrb[8].mxu0  ;;  %v646_v14 = vpop.f32.mrb[8].mxu1  ;;  %v688_v15 = vsel %vm656_vm9, %v586_v53, %v672_v59  ;;  %v1723_v5 = vld [vmem:[%s1637_s8 + $0x18] sm:$0xff] }
 0x22f   : > { %v693_v12 = vsel %vm661_vm12, %v641_v61, %v677_v6  ;;  %v707_v16 = vpack.c.bf16 %v691_v11, %v1700_v1  ;;  %v594_v22 = vadd.f32 %v593_v13, %v512_v7  ;;  %v647_v23 = vadd.f32 %v646_v14, %v512_v7  ;;  %v595_v24 = vpop.f32.mrb[9].mxu0  ;;  %v648_v25 = vpop.f32.mrb[9].mxu1 }
 0x230   : > { %v709_v21 = vpack.c.bf16 %v693_v12, %v689_v8  ;;  %v596_v26 = vadd.f32 %v595_v24, %v512_v7  ;;  %v649_v27 = vadd.f32 %v648_v25, %v512_v7  ;;  %v597_v28 = vpop.f32.mrb[10].mxu0  ;;  %v650_v29 = vpop.f32.mrb[10].mxu1  ;;  %v692_v30 = vsel %vm660_vm13, %v590_v3, %v676_v9  ;;  %v340_v3 = vld [vmem:[%s1637_s8 + $0x10] sm:$0xff] }
 0x231   : > { %v690_v31 = vsel %vm658_vm10, %v639_v54, %v674_v2  ;;  %vm663_vm15 = vcmp.ge.f32.partialorder %v594_v22, 0.0  ;;  %v679_v32 = vmul.f32 0.22916667, %v594_v22  ;;  %vm665_vm0 = vcmp.ge.f32.partialorder %v647_v23, 0.0  ;;  %v599_v41 = vpop.f32.mrb[11].mxu0  ;;  %v652_v42 = vpop.f32.mrb[11].mxu1 }
 0x232   : > { %v694_v33 = vsel %vm662_vm14, %v643_v4, %v678_v10  ;;  %v681_v35 = vmul.f32 0.22916667, %v647_v23  ;;  %vm664_vm1 = vcmp.ge.f32.partialorder %v596_v26, 0.0  ;;  %v680_v36 = vmul.f32 0.22916667, %v596_v26  ;;  %v357_v1 = vpop.permute.xlu1 %356  ;;  %v338_v2 = vld [vmem:[%s1637_s8] sm:$0xff] }
 0x233   : > { %vm666_vm2 = vcmp.ge.f32.partialorder %v649_v27, 0.0  ;;  %v695_v37 = vsel %vm663_vm15, %v594_v22, %v679_v32  ;;  %v682_v38 = vmul.f32 0.22916667, %v649_v27  ;;  %v598_v39 = vadd.f32 %v597_v28, %v517_v34  ;;  %v339_v4 = vld [vmem:[%s1637_s8 + $0x8] sm:$0xff]  ;;  %s1117_s8 = sshll.u32 %s1628_s15, 7 }
 0x234   : > { %v651_v40 = vadd.f32 %v650_v29, %v517_v34  ;;  %v600_v43 = vadd.f32 %v599_v41, %v517_v34  ;;  %v653_v44 = vadd.f32 %v652_v42, %v517_v34  ;;  %v708_v45 = vpack.c.bf16 %v692_v30, %v688_v15  ;;  %s1771_s30 = scalar_lea.vmem [#allocation7], %s1117_s8 }
 0x235   : > { %v710_v46 = vpack.c.bf16 %v694_v33, %v690_v31  ;;  %vm667_vm3 = vcmp.ge.f32.partialorder %v598_v39, 0.0  ;;  %v683_v47 = vmul.f32 0.22916667, %v598_v39  ;;  %v697_v51 = vsel %vm665_vm0, %v647_v23, %v681_v35  ;;  %s986_s7 = sshll.u32 %s1771_s30, 4  ;;  %s1810_s7 = int_to_ptr.vmem [resolvable:$true] %s986_s7 }
 0x236   : > { %vm669_vm4 = vcmp.ge.f32.partialorder %v651_v40, 0.0  ;;  %v685_v48 = vmul.f32 0.22916667, %v651_v40  ;;  %vm668_vm5 = vcmp.ge.f32.partialorder %v600_v43, 0.0  ;;  %v684_v49 = vmul.f32 0.22916667, %v600_v43  ;;  %752 = vmatprep.subr.bf16.mxu0 %v708_v45  ;;  %v723_v11 = vpop.permute.xlu1 %722  ;;  %p1315_p7 = scmp.lt.s32.totalorder %s1810_s7, %s1313_s0 }
 0x237   : > { %vm670_vm6 = vcmp.ge.f32.partialorder %v653_v44, 0.0  ;;  %v686_v50 = vmul.f32 0.22916667, %v653_v44  ;;  %805 = vmatprep.subr.bf16.mxu1 %v710_v46  ;;  %v699_v52 = vsel %vm667_vm3, %v598_v39, %v683_v47  ;;  %753 = vmatpush1.bf16.msra.mxu0 %v707_v16  ;;  %v696_v56 = vsel %vm664_vm1, %v596_v26, %v680_v36  ;;  %s1308_s9 = scalar_lea.vmem %s1810_s7, 2048 }
 0x238   : > { %v701_v53 = vsel %vm669_vm4, %v651_v40, %v685_v48  ;;  %806 = vmatpush1.bf16.msra.mxu1 %v709_v21  ;;  %v711_v54 = vpack.c.bf16 %v699_v52, %v695_v37  ;;  %v700_v57 = vsel %vm668_vm5, %v600_v43, %v684_v49  ;;  %v698_v59 = vsel %vm666_vm2, %v649_v27, %v682_v38  ;;  %p1309_p8 = scmp.ne.s32.totalorder %s1810_s7, %s1308_s9  ;;  %p1316_p10 = scmp.lt.s32.totalorder %s1314_s18, %s1308_s9 }
 0x239   : > { %v713_v55 = vpack.c.bf16 %v701_v53, %v697_v51  ;;  %v712_v58 = vpack.c.bf16 %v700_v57, %v696_v56  ;;  %v702_v60 = vsel %vm670_vm6, %v653_v44, %v686_v50  ;;  %vm745_vm7 = vcmask 261120  }
 0x23a   : > { %v714_v61 = vpack.c.bf16 %v702_v60, %v698_v59  ;;  %v428_v6 = vadd.f32 %v1682_v17, %v357_v1  ;;  %vm858_vm8 = vcmp.eq.s32.totalorder %v338_v2, 0  ;;  %vm860_vm9 = vcmp.eq.s32.totalorder %v340_v3, 0  ;;  %p1310_p1 = pnand %p1309_p8, %p1906_p0  ;;  %p1317_p9 = por %p1316_p10, %p1315_p7 }
 0x23b   : > { %754 = vmatprep.subr.bf16.mxu0 %v712_v58  ;;  %vm886_vm10 = vcmp.eq.s32.totalorder %v338_v2, 1  ;;  %v471_v7 = vadd.f32 %v1684_v18, %v357_v1  ;;  %v1729_v8 = vadd.f32 %v1688_v20, %v357_v1  ;;  %vm888_vm11 = vcmp.eq.s32.totalorder %v340_v3, 1  ;;  %v718_v18 = vpop.permute.xlu0 %717 }
 0x23c   : > { %807 = vmatprep.subr.bf16.mxu1 %v714_v61  ;;  %755 = vmatpush1.bf16.msra.mxu0 %v711_v54  ;;  %vm859_vm12 = vcmp.eq.s32.totalorder %v339_v4, 0  ;;  %vm861_vm13 = vcmp.eq.s32.totalorder %v1723_v5, 0  ;;  %vm887_vm14 = vcmp.eq.s32.totalorder %v339_v4, 1  ;;  %vm914_vm15 = vcmp.eq.s32.totalorder %v338_v2, 2  ;;  %p1311_p6 = pneg %p1310_p1 }
 0x23d   : > { %808 = vmatpush1.bf16.msra.mxu1 %v713_v55  ;;  %vm889_vm0 = vcmp.eq.s32.totalorder %v1723_v5, 1  ;;  %vm916_vm1 = vcmp.eq.s32.totalorder %v340_v3, 2  ;;  %vm942_vm2 = vcmp.eq.s32.totalorder %v338_v2, 3  ;;  %vm944_vm3 = vcmp.eq.s32.totalorder %v340_v3, 3 }
 0x23e   : > { %v862_v17 = vsel %vm858_vm8, %v428_v6, 0.0  ;;  %vm915_vm4 = vcmp.eq.s32.totalorder %v339_v4, 2  ;;  %vm917_vm5 = vcmp.eq.s32.totalorder %v1723_v5, 2  ;;  %vm943_vm6 = vcmp.eq.s32.totalorder %v339_v4, 3  ;;  %p1318_p12 = pnand %p1317_p9, %p1311_p6 }
 0x23f   : > { %1135 = vmatmul.mubr.msk.bf16.vlgmr.msra.gmra.mrb[12].mxu0 %vm745_vm7, %v1246_v62  ;;  %v865_v9 = vsel %vm861_vm13, %v1729_v8, 0.0  ;;  %v890_v10 = vsel %vm886_vm10, %v428_v6, 0.0  ;;  %v892_v13 = vsel %vm888_vm11, %v471_v7, 0.0  ;;  %v1742_v15 = vsel %vm889_vm0, %v1729_v8, 0.0  ;;  %v728_v51 = vpop.permute.xlu0 %727 }
 0x240   : > { %1137 = vmatmul.mubr.msk.bf16.vlgmr.msra.gmra.mrb[12].mxu1 %vm745_vm7, %v1246_v62  ;;  %794 = vmatprep.mubr.bf16.mxu0 %v1417_v0  ;;  %v1745_v16 = vsel %vm914_vm15, %v428_v6, 0.0  ;;  %v1748_v24 = vsel %vm916_vm1, %v471_v7, 0.0  ;;  %v1756_v26 = vsel %vm917_vm5, %v1729_v8, 0.0  ;;  %v1760_v31 = vsel %vm942_vm2, %v428_v6, 0.0 }
 0x241   : > { %847 = vmatprep.mubr.bf16.mxu1 %v1417_v0  ;;  %v430_v0 = vadd.f32 %v1686_v19, %v357_v1  ;;  %v864_v19 = vsel %vm860_vm9, %v471_v7, 0.0  ;;  %v1763_v32 = vsel %vm944_vm3, %v471_v7, 0.0 }
 0x243   : > { %v863_v20 = vsel %vm859_vm12, %v430_v0, 0.0  ;;  %v891_v14 = vsel %vm887_vm14, %v430_v0, 0.0  ;;  %v1751_v25 = vsel %vm915_vm4, %v430_v0, 0.0  ;;  %v1766_v38 = vsel %vm943_vm6, %v430_v0, 0.0 }
 0x244   : > { %vm945_vm12 = vcmp.eq.s32.totalorder %v1723_v5, 3 }
 0x247   : > { %1136 = vmatmul.mubr.msk.bf16.gmra.mrb[16].mxu0 %vm745_vm7, %v1247_v63 }
 0x248   : > { %1138 = vmatmul.mubr.msk.bf16.gmra.mrb[16].mxu1 %vm745_vm7, %v1247_v63 }
 0x312   : > { %v786_v12 = vpop.f32.mrb[12].mxu0 }
 0x313   : > { %v787_v21 = vadd.f32 %v786_v12, %v718_v18  ;;  %v839_v22 = vpop.f32.mrb[12].mxu1  ;;  %v788_v23 = vpop.f32.mrb[13].mxu0 }
 0x314   : > { %v840_v27 = vadd.f32 %v839_v22, %v718_v18  ;;  %v789_v28 = vadd.f32 %v788_v23, %v718_v18  ;;  %v841_v29 = vpop.f32.mrb[13].mxu1  ;;  %v790_v30 = vpop.f32.mrb[14].mxu0 }
 0x315   : > { %v866_v33 = vadd.f32 %v862_v17, %v787_v21  ;;  %v842_v34 = vadd.f32 %v841_v29, %v718_v18  ;;  %v791_v35 = vadd.f32 %v790_v30, %v723_v11  ;;  %v843_v36 = vpop.f32.mrb[14].mxu1  ;;  %v792_v37 = vpop.f32.mrb[15].mxu0 }
 0x316   : > { %v868_v39 = vadd.f32 %v864_v19, %v840_v27  ;;  %v867_v40 = vadd.f32 %v863_v20, %v789_v28  ;;  %v844_v41 = vadd.f32 %v843_v36, %v723_v11  ;;  %v793_v42 = vadd.f32 %v792_v37, %v723_v11  ;;  %v845_v43 = vpop.f32.mrb[15].mxu1 }
 0x317   : > { %vm870_vm7 = vcmp.ge.f32.partialorder %v866_v33, 0.0  ;;  %v874_v44 = vmul.f32 0.22916667, %v866_v33  ;;  %v869_v45 = vadd.f32 %v865_v9, %v842_v34  ;;  %v894_v46 = vadd.f32 %v890_v10, %v791_v35 }
 0x318   : > { %vm872_vm8 = vcmp.ge.f32.partialorder %v868_v39, 0.0  ;;  %v876_v47 = vmul.f32 0.22916667, %v868_v39  ;;  %vm871_vm9 = vcmp.ge.f32.partialorder %v867_v40, 0.0  ;;  %v875_v48 = vmul.f32 0.22916667, %v867_v40 }
 0x319   : > { %v878_v49 = vsel %vm870_vm7, %v866_v33, %v874_v44  ;;  %vm873_vm10 = vcmp.ge.f32.partialorder %v869_v45, 0.0  ;;  %v877_v50 = vmul.f32 0.22916667, %v869_v45  ;;  %vm898_vm11 = vcmp.ge.f32.partialorder %v894_v46, 0.0 }
 0x31a   : > { %882 = vst [vmem:[%s1771_s30] sm:$0xff] %v878_v49  ;;  %v880_v52 = vsel %vm872_vm8, %v868_v39, %v876_v47  ;;  %v879_v53 = vsel %vm871_vm9, %v867_v40, %v875_v48  ;;  %v902_v54 = vmul.f32 0.22916667, %v894_v46  ;;  %v896_v55 = vadd.f32 %v892_v13, %v844_v41  ;;  %v796_v56 = vpop.f32.mrb[16].mxu0 }
 0x31b   : > { %884 = vst [vmem:[%s1771_s30 + $0x10] sm:$0xff] %v880_v52  ;;  %883 = vst [vmem:[%s1771_s30 + $0x8] sm:$0xff] %v879_v53  ;;  %v881_v57 = vsel %vm873_vm10, %v869_v45, %v877_v50  ;;  %v895_v58 = vadd.f32 %v891_v14, %v793_v42  ;;  %v846_v59 = vadd.f32 %v845_v43, %v723_v11  ;;  %v849_v61 = vpop.f32.mrb[16].mxu1  ;;  %v798_v62 = vpop.f32.mrb[17].mxu0  ;;  %v949_v37 = vsel %vm945_vm12, %v1729_v8, 0.0 }
 0x31c   : > { %v797_v60 = vadd.f32 %v796_v56, %v728_v51  ;;  %885 = vst [vmem:[%s1771_s30 + $0x18] sm:$0xff] %v881_v57  ;;  %v906_v63 = vsel %vm898_vm11, %v894_v46, %v902_v54  ;;  %vm900_vm13 = vcmp.ge.f32.partialorder %v896_v55, 0.0  ;;  %v904_v1 = vmul.f32 0.22916667, %v896_v55  ;;  %v851_v3 = vpop.f32.mrb[17].mxu1  ;;  %v800_v4 = vpop.f32.mrb[18].mxu0 }
 0x31d   : > { %v850_v2 = vadd.f32 %v849_v61, %v728_v51  ;;  %910 = vst [vmem:[%s1771_s30 + $0x20] sm:$0xff] %v906_v63  ;;  %vm899_vm14 = vcmp.ge.f32.partialorder %v895_v58, 0.0  ;;  %v903_v6 = vmul.f32 0.22916667, %v895_v58  ;;  %v897_v7 = vadd.f32 %v1742_v15, %v846_v59  ;;  %v853_v17 = vpop.f32.mrb[18].mxu1  ;;  %v802_v18 = vpop.f32.mrb[19].mxu0 }
 0x31e   : > { %v922_v0 = vadd.f32 %v1745_v16, %v797_v60  ;;  %v908_v19 = vsel %vm900_vm13, %v896_v55, %v904_v1  ;;  %v799_v9 = vadd.f32 %v798_v62, %v728_v51  ;;  %v852_v10 = vadd.f32 %v851_v3, %v728_v51  ;;  %v855_v11 = vpop.f32.mrb[19].mxu1  ;;  %v733_v14 = vpop.permute.xlu1 %732 }
 0x31f   : > { %v924_v20 = vadd.f32 %v1748_v24, %v850_v2  ;;  %912 = vst [vmem:[%s1771_s30 + $0x30] sm:$0xff] %v908_v19  ;;  %v907_v12 = vsel %vm899_vm14, %v895_v58, %v903_v6  ;;  %vm901_vm15 = vcmp.ge.f32.partialorder %v897_v7, 0.0  ;;  %v905_v13 = vmul.f32 0.22916667, %v897_v7 }
 0x320   : > { %vm926_vm0 = vcmp.ge.f32.partialorder %v922_v0, 0.0  ;;  %911 = vst [vmem:[%s1771_s30 + $0x28] sm:$0xff] %v907_v12  ;;  %v930_v15 = vmul.f32 0.22916667, %v922_v0  ;;  %v923_v21 = vadd.f32 %v1751_v25, %v799_v9  ;;  %v925_v23 = vadd.f32 %v1756_v26, %v852_v10 }
 0x321   : > { %vm928_vm1 = vcmp.ge.f32.partialorder %v924_v20, 0.0  ;;  %v932_v16 = vmul.f32 0.22916667, %v924_v20  ;;  %v909_v22 = vsel %vm901_vm15, %v897_v7, %v905_v13  ;;  %v801_v24 = vadd.f32 %v800_v4, %v733_v14 }
 0x322   : > { %v854_v27 = vadd.f32 %v853_v17, %v733_v14  ;;  %913 = vst [vmem:[%s1771_s30 + $0x38] sm:$0xff] %v909_v22  ;;  %v934_v28 = vsel %vm926_vm0, %v922_v0, %v930_v15  ;;  %vm927_vm2 = vcmp.ge.f32.partialorder %v923_v21, 0.0  ;;  %v931_v30 = vmul.f32 0.22916667, %v923_v21 }
 0x323   : > { %v936_v29 = vsel %vm928_vm1, %v924_v20, %v932_v16  ;;  %938 = vst [vmem:[%s1771_s30 + $0x40] sm:$0xff] %v934_v28  ;;  %vm929_vm3 = vcmp.ge.f32.partialorder %v925_v23, 0.0  ;;  %v933_v33 = vmul.f32 0.22916667, %v925_v23  ;;  %v950_v25 = vadd.f32 %v1760_v31, %v801_v24 }
 0x324   : > { %940 = vst [vmem:[%s1771_s30 + $0x50] sm:$0xff] %v936_v29  ;;  %v952_v26 = vadd.f32 %v1763_v32, %v854_v27  ;;  %v935_v34 = vsel %vm927_vm2, %v923_v21, %v931_v30  ;;  %v803_v35 = vadd.f32 %v802_v18, %v733_v14  ;;  %v856_v36 = vadd.f32 %v855_v11, %v733_v14 }
 0x325   : > { %939 = vst [vmem:[%s1771_s30 + $0x48] sm:$0xff] %v935_v34  ;;  %v937_v39 = vsel %vm929_vm3, %v925_v23, %v933_v33  ;;  %vm954_vm4 = vcmp.ge.f32.partialorder %v950_v25, 0.0  ;;  %v958_v40 = vmul.f32 0.22916667, %v950_v25 }
 0x326   : > { %vm956_vm5 = vcmp.ge.f32.partialorder %v952_v26, 0.0  ;;  %941 = vst [vmem:[%s1771_s30 + $0x58] sm:$0xff] %v937_v39  ;;  %v960_v31 = vmul.f32 0.22916667, %v952_v26  ;;  %v951_v32 = vadd.f32 %v1766_v38, %v803_v35  ;;  %v953_v41 = vadd.f32 %v949_v37, %v856_v36 }
 0x327   : > { %v962_v42 = vsel %vm954_vm4, %v950_v25, %v958_v40 }
 0x328   : > { %966 = vst [vmem:[%s1771_s30 + $0x60] sm:$0xff] %v962_v42  ;;  %v964_v5 = vsel %vm956_vm5, %v952_v26, %v960_v31  ;;  %vm955_vm6 = vcmp.ge.f32.partialorder %v951_v32, 0.0  ;;  %v959_v8 = vmul.f32 0.22916667, %v951_v32  ;;  %vm957_vm7 = vcmp.ge.f32.partialorder %v953_v41, 0.0 }
 0x329   : > { %968 = vst [vmem:[%s1771_s30 + $0x70] sm:$0xff] %v964_v5  ;;  %v961_v43 = vmul.f32 0.22916667, %v953_v41 }
 0x32a   : > { %v963_v38 = vsel %vm955_vm6, %v951_v32, %v959_v8 }
 0x32b   : > { %967 = vst [vmem:[%s1771_s30 + $0x68] sm:$0xff] %v963_v38  ;;  %v965_v44 = vsel %vm957_vm7, %v953_v41, %v961_v43 }
 0x32c   : > { %969 = vst [vmem:[%s1771_s30 + $0x78] sm:$0xff] %v965_v44 }
 0x32d   : > { %1321 = shalt.err (!%p1318_p12)
}
 0x32e   : > { %s1322_s29 = scalar_lea.hbm %s1807_s12, 2048  ;;  %s1326_s17 = scalar_lea.hbm %s1905_s11, 8192 }
 0x32f   : > { %p1323_p5 = scmp.ne.s32.totalorder %s1807_s12, %s1322_s29  ;;  %p1327_p4 = scmp.lt.u32.totalorder %s1807_s12, %s1905_s11 }
 0x330   : > { %p1328_p13 = scmp.lt.u32.totalorder %s1326_s17, %s1322_s29  ;;  %p1330_p8 = scmp.lt.u32.totalorder %s1322_s29, %s1807_s12 }
 0x331   : > { %p1324_p11 = pnand %p1323_p5, %p1906_p0 }
 0x332   : > { %p1329_p3 = por %p1328_p13, %p1327_p4 }
 0x333   : > { %p1325_p2 = pneg %p1324_p11 }
 0x334   : > { %p1331_p1 = por %p1330_p8, %p1329_p3 }
 0x336   : > { %p1332_p6 = pnand %p1331_p1, %p1325_p2 }
 0x338   : > { %1335 = shalt.err (!%p1332_p6)
}
 0x339   : > { %s1419_s16 = smov 512   ;;  %s1420_s19 = smov 1024  }
 0x33a   : > { %s1421_s24 = smov 32  }
 0x33b   : > { %1149 = dma.vmem_to_hbm [thread:$0]  (%p1906_p0), %s1810_s7, 2048, %s1807_s12, %s971_s10, %s1419_s16, %s1420_s19, %s1421_s24  }
 0x33c PF: > { %s1907_s25 = sld [smem:[#allocation11_spill]]  ;;  %s1908_s23 = sld [smem:[#allocation16_spill]] }
 0x33d   : > { %p1163_p7 = scmp.ge.s32.totalorder %s1410_s28, 2 }
 0x342   : > { %s1001_s13 = sand.u32 1, %s1907_s25   ;;  %p1909_p10 = scmp.ne.s32.totalorder %s1908_s23, 0 }
 0x343   : > { %s1002_s9 = scalar_lea.sflag [#allocation4], %s1001_s13 }
 0x344   : > { %p1159_p9 = pnand %p1163_p7, %p1909_p10 }
 0x346   : > { %1377 = dma.done.wait (!%p1159_p9), %s1002_s9, 2048  }
 0x347   : > { %1379 = vsyncadd (!%p1159_p9), %s1002_s9, 4294965248  ;;  %s25_s28 = sadd.s32 1, %s1410_s28   ;;  %s1910_s20 = sld [smem:[#allocation12_spill]] }
 0x348   : > { %p22_p12 = scmp.ge.s32.totalorder %s25_s28, 6   ;;  %s1911_s23 = sld [smem:[#allocation17_spill]] }
 0x349   : > { %s1912_s15 = sld [smem:[#allocation13_spill]]  ;;  %s1913_s7 = sld [smem:[#allocation14_spill]] }
 0x34a   : > { %s1914_s21 = smov %s1386_s22  ;;  %s1916_s24 = smov %s1402_s26 }
 0x34b   : > { %s1917_s25 = smov %s1406_s27  ;;  %24 = sbr.rel (!%p22_p12) target bundleno = 12 (0xc), region = 102 }
 0x34d   : > { %s1915_s22 = smov %s1910_s20 }
 0x34f   : > { %s1918_s26 = smov %s1912_s15  ;;  %s1919_s27 = smov %s1913_s7 }
 0x352   :  { %1007 = vsyncpa [#allocation3], 1 }
 0x353   :  { %1009 = vsyncpa [#allocation3 + $0x1], 1 }
 0x354   :  { %1010 = vsyncpa [#allocation6], 1 }
 0x355   :  { %1012 = vsyncpa [#allocation6 + $0x1], 1 }
 0x356   :  { %1013 = vsyncpa [#allocation4], 1 }
 0x357   :  { %1015 = vsyncpa [#allocation4 + $0x1], 1 }

</bundles_post_ra>
